<compile_context>
chip_gen: v5e
topology: v5e:2x2
jax: 0.10.0
libtpu: 0.0.40
codegen_flags: <defaults>
</compile_context>

<pallas_src>
import functools

import jax
import jax.numpy as jnp
from jax.experimental import pallas as pl
from jax.experimental.pallas import tpu as pltpu

_LANE = 128
_TARGET_TILE_BYTES = 2 << 20   # ~2 MiB per input tile (per perf review)


def _elem_loss(x, y, beta):
    """Elementwise SmoothL1 (f32). beta <= 0 degenerates to pure L1 (PyTorch)."""
    d = x.astype(jnp.float32) - y.astype(jnp.float32)
    ad = jnp.abs(d)
    if beta > 0.0:
        return jnp.where(ad < beta, d * d * (0.5 / beta), ad - 0.5 * beta)
    return ad


def _smooth_l1_kernel(x_ref, y_ref, out_ref, acc_ref, *,
                      beta, rows, block_rows, steps):
    c = pl.program_id(0)          # parallel split (2nd TensorCore where present)
    i = pl.program_id(1)          # sequential reduction steps within a split

    @pl.when(i == 0)
    def _():
        acc_ref[...] = jnp.zeros_like(acc_ref)

    # In-kernel upcast keeps HBM traffic at the native dtype width.
    loss = _elem_loss(x_ref[...], y_ref[...], beta)   # (block_rows, 128) f32

    def accumulate(vals):
        if block_rows % 8 == 0:
            # Tile-aligned grouped sublane sum -> pure VPU vreg adds.
            acc_ref[...] += vals.reshape(block_rows // 8, 8, _LANE).sum(axis=0)
        else:
            # Small odd-row block (only when block_rows == rows < 8*k): one
            # sublane reduce folded into sublane 0 of the accumulator.
            acc_ref[0:1, :] = acc_ref[0:1, :] + jnp.sum(vals, axis=0,
                                                        keepdims=True)

    blk = c * steps + i                       # intended (un-clamped) block idx
    row0 = blk * block_rows
    needs_mask = row0 + block_rows > rows     # last partial / overflow blocks

    @pl.when(needs_mask)
    def _():
        local = jax.lax.broadcasted_iota(jnp.int32, (block_rows, _LANE), 0)
        valid = (row0 + local) < rows
        # Keep this a true select: OOB garbage/NaN must not leak.
        accumulate(jnp.where(valid, loss, 0.0))

    @pl.when(jnp.logical_not(needs_mask))
    def _():
        accumulate(loss)

    @pl.when(i == pl.num_programs(1) - 1)
    def _():
        out_ref[...] = acc_ref[...]           # (8,128) lane-dense partial


def _num_tensorcores():
    """Best-effort per-chip TensorCore count (2 on megacore parts, else 1)."""
    try:
        info = pltpu.get_tpu_info()
        for attr in ("num_cores", "core_count", "num_tensorcores",
                     "cores_per_chip", "tensorcores_per_chip"):
            v = getattr(info, attr, None)
            if isinstance(v, int) and v > 0:
                return v
    except Exception:
        pass
    try:
        kind = jax.devices()[0].device_kind.lower()
        if ("v4" in kind) or ("v5p" in kind) or ("v7" in kind):
            return 2
    except Exception:
        pass
    return 1


def smooth_l1_loss_mean(x, y, beta=1.0, *, max_block_rows=None):
    """SmoothL1Loss with mean reduction (matches torch.nn.SmoothL1Loss)."""
    n = int(x.size)
    if n == 0:
        # PyTorch: mean reduction over zero elements -> nan (the zero_size case).
        return jnp.float32(jnp.nan)

    beta = float(beta)
    xf = x.reshape(-1)
    yf = y.reshape(-1)

    tail = n % _LANE
    main = n - tail

    tail_sum = jnp.float32(0.0)
    if tail:
        # <128-element tail handled with plain jnp: avoids materializing a full
        # padded copy of both inputs in HBM for ragged sizes.
        tail_sum = jnp.sum(_elem_loss(xf[main:], yf[main:], beta))

    if main == 0:
        return tail_sum / jnp.float32(n)

    rows = main // _LANE
    x2 = xf[:main].reshape(rows, _LANE)
    y2 = yf[:main].reshape(rows, _LANE)

    # Byte-budget block sizing (native dtype): ~2 MiB per input tile.
    itemsize = jnp.dtype(x.dtype).itemsize
    sub_mult = max(8, 32 // itemsize)                 # 8 f32, 16 bf16, 32 int8
    budget_rows = max(sub_mult,
                      (_TARGET_TILE_BYTES // (itemsize * _LANE))
                      // sub_mult * sub_mult)
    if max_block_rows is not None:                    # test / tuning override
        budget_rows = min(budget_rows, max(8, (int(max_block_rows) // 8) * 8))
    # block never exceeds the array: either the full row extent, or a
    # sublane-aligned tile (partial last block handled by the in-kernel mask).
    block_rows = rows if rows <= budget_rows else budget_rows

    total_blocks = -(-rows // block_rows)
    nsplit = max(1, min(_num_tensorcores(), total_blocks))
    steps = -(-total_blocks // nsplit)

    def in_map(c, i):
        # Clamp so the DMA never walks past the array; the overflow blocks of
        # the last split are fully zeroed in-kernel by the row mask.
        return (jnp.minimum(c * steps + i, total_blocks - 1), 0)

    kernel = functools.partial(
        _smooth_l1_kernel, beta=beta, rows=rows,
        block_rows=block_rows, steps=steps)

    partials = pl.pallas_call(
        kernel,
        out_shape=jax.ShapeDtypeStruct((nsplit * 8, _LANE), jnp.float32),
        grid_spec=pltpu.PrefetchScalarGridSpec(
            num_scalar_prefetch=0,
            grid=(nsplit, steps),
            in_specs=[
                pl.BlockSpec((block_rows, _LANE), in_map),
                pl.BlockSpec((block_rows, _LANE), in_map),
            ],
            out_specs=pl.BlockSpec((8, _LANE), lambda c, i: (c, 0)),
            scratch_shapes=[pltpu.VMEM((8, _LANE), jnp.float32)],
        ),
        compiler_params=pltpu.CompilerParams(
            dimension_semantics=("parallel", "arbitrary")),
    )(x2, y2)

    return (jnp.sum(partials) + tail_sum) / jnp.float32(n)


if __name__ == "__main__":
    key = jax.random.PRNGKey(0)
    kx, ky = jax.random.split(key)

    def ref_loss(x, y, beta=1.0):
        d = x.astype(jnp.float32) - y.astype(jnp.float32)
        ad = jnp.abs(d)
        per = jnp.where(ad < beta, 0.5 * d * d / beta, ad - 0.5 * beta)
        return jnp.mean(per)

    # Primary small case consistent with an elementwise NCHW loss.
    shape = (2, 4, 16, 16)
    x = jax.random.normal(kx, shape, dtype=jnp.float32)
    y = jax.random.normal(ky, shape, dtype=jnp.float32)
    out = jax.block_until_ready(smooth_l1_loss_mean(x, y, beta=1.0))
    assert jnp.allclose(out, ref_loss(x, y), rtol=1e-5, atol=1e-6), (out, ref_loss(x, y))

    # Ragged numel (not a multiple of 128) -> prefix kernel + jnp tail.
    xr = jax.random.normal(kx, (3, 5, 7, 11), dtype=jnp.float32)
    yr = jax.random.normal(ky, (3, 5, 7, 11), dtype=jnp.float32)
    outr = jax.block_until_ready(smooth_l1_loss_mean(xr, yr))
    assert jnp.allclose(outr, ref_loss(xr, yr), rtol=1e-5, atol=1e-6), outr

    # Multi-block + parallel-split path (small block override to exercise the
    # partial last block and the clamped overflow block of the last split).
    xs = jax.random.normal(kx, (3, 8, 128, 128), dtype=jnp.float32)
    ys = jax.random.normal(ky, (3, 8, 128, 128), dtype=jnp.float32)
    outs = jax.block_until_ready(smooth_l1_loss_mean(xs, ys, max_block_rows=1024))
    assert jnp.allclose(outs, ref_loss(xs, ys), rtol=1e-4, atol=1e-6), outs

    # bf16 inputs stay bf16 in HBM; upcast happens inside the kernel.
    xb = x.astype(jnp.bfloat16)
    yb = y.astype(jnp.bfloat16)
    outb = jax.block_until_ready(smooth_l1_loss_mean(xb, yb))
    assert jnp.allclose(outb, ref_loss(xb, yb), rtol=1e-3, atol=1e-3), outb

    # Zero-size case (the module's namesake): mean over 0 elements -> nan.
    z = jnp.zeros((0, 3), jnp.float32)
    assert jnp.isnan(smooth_l1_loss_mean(z, z))

    print("KERNEL_OK")
</pallas_src>

<mosaic_0001>
module attributes {stable_mosaic.version = 11 : i64} {
  func.func @_smooth_l1_kernel(%arg0: i32, %arg1: i32, %arg2: memref<16x128xf32, #tpu.memory_space<vmem>>, %arg3: memref<16x128xf32, #tpu.memory_space<vmem>>, %arg4: memref<8x128xf32, #tpu.memory_space<vmem>>, %arg5: memref<8x128xf32, #tpu.memory_space<vmem>>) attributes {dimension_semantics = [#tpu.dimension_semantics<parallel>, #tpu.dimension_semantics<arbitrary>], iteration_bounds = array<i64: 1, 1>, scalar_prefetch = 0 : i64, scratch_operands = 1 : i64, tpu.core_type = #tpu.core_type<tc>, window_params = [{transform_indices = @transform_0, window_bounds = array<i64: 16, 128>}, {transform_indices = @transform_1, window_bounds = array<i64: 16, 128>}, {transform_indices = @transform_2, window_bounds = array<i64: 8, 128>}]} {
    %c0_i32 = arith.constant 0 : i32
    %0 = arith.cmpi eq, %arg1, %c0_i32 : i32
    %1 = arith.extui %0 : i1 to i32
    %c0_i32_0 = arith.constant 0 : i32
    %2 = arith.cmpi ne, %1, %c0_i32_0 : i32
    scf.if %2 {
      %cst_12 = arith.constant 0.000000e+00 : f32
      %28 = vector.broadcast %cst_12 : f32 to vector<8x128xf32>
      %c0_13 = arith.constant 0 : index
      %c0_14 = arith.constant 0 : index
      %29 = vector.load %arg5[%c0_13, %c0_14] : memref<8x128xf32, #tpu.memory_space<vmem>>, vector<8x128xf32>
      tpu.vector_store %arg5[%c0_13, %c0_14], %28 {strides = array<i32>} : memref<8x128xf32, #tpu.memory_space<vmem>>, vector<8x128xf32>,
    } else {
    }
    %c0 = arith.constant 0 : index
    %c0_1 = arith.constant 0 : index
    %3 = vector.load %arg2[%c0, %c0_1] : memref<16x128xf32, #tpu.memory_space<vmem>>, vector<16x128xf32>
    %c0_2 = arith.constant 0 : index
    %c0_3 = arith.constant 0 : index
    %4 = vector.load %arg3[%c0_2, %c0_3] : memref<16x128xf32, #tpu.memory_space<vmem>>, vector<16x128xf32>
    %5 = arith.subf %3, %4 : vector<16x128xf32>
    %6 = math.absf %5 : vector<16x128xf32>
    %cst = arith.constant 1.000000e+00 : f32
    %7 = vector.broadcast %cst : f32 to vector<16x128xf32>
    %8 = arith.cmpf olt, %6, %7 : vector<16x128xf32>
    %9 = arith.mulf %5, %5 : vector<16x128xf32>
    %cst_4 = arith.constant 5.000000e-01 : f32
    %10 = vector.broadcast %cst_4 : f32 to vector<16x128xf32>
    %11 = arith.mulf %9, %10 : vector<16x128xf32>
    %cst_5 = arith.constant 5.000000e-01 : f32
    %12 = vector.broadcast %cst_5 : f32 to vector<16x128xf32>
    %13 = arith.subf %6, %12 : vector<16x128xf32>
    %14 = arith.select %8, %11, %13 : vector<16x128xi1>, vector<16x128xf32>
    %c1_i32 = arith.constant 1 : i32
    %15 = arith.muli %arg0, %c1_i32 : i32
    %16 = arith.addi %15, %arg1 : i32
    %c16_i32 = arith.constant 16 : i32
    %17 = arith.muli %16, %c16_i32 : i32
    %c16_i32_6 = arith.constant 16 : i32
    %18 = arith.addi %17, %c16_i32_6 : i32
    %c16_i32_7 = arith.constant 16 : i32
    %19 = arith.cmpi sgt, %18, %c16_i32_7 : i32
    %20 = arith.extui %19 : i1 to i32
    %c0_i32_8 = arith.constant 0 : i32
    %21 = arith.cmpi ne, %20, %c0_i32_8 : i32
    scf.if %21 {
      %28 = tpu.iota {dimensions = array<i32: 0>} : vector<16x128xi32>
      %29 = vector.broadcast %17 : i32 to vector<16x128xi32>
      %30 = arith.addi %29, %28 : vector<16x128xi32>
      %c16_i32_12 = arith.constant 16 : i32
      %31 = vector.broadcast %c16_i32_12 : i32 to vector<16x128xi32>
      %32 = arith.cmpi slt, %30, %31 : vector<16x128xi32>
      %cst_13 = arith.constant 0.000000e+00 : f32
      %33 = vector.broadcast %cst_13 : f32 to vector<16x128xf32>
      %34 = arith.select %32, %14, %33 : vector<16x128xi1>, vector<16x128xf32>
      %c0_14 = arith.constant 0 : index
      %c0_15 = arith.constant 0 : index
      %35 = vector.load %arg5[%c0_14, %c0_15] : memref<8x128xf32, #tpu.memory_space<vmem>>, vector<8x128xf32>
      %36 = vector.shape_cast %34 : vector<16x128xf32> to vector<2x8x128xf32>
      %cst_16 = arith.constant dense<0.000000e+00> : vector<8x128xf32>
      %37 = vector.multi_reduction <add>, %36, %cst_16 [0] : vector<2x8x128xf32> to vector<8x128xf32>
      %38 = arith.addf %35, %37 : vector<8x128xf32>
      %c0_17 = arith.constant 0 : index
      %c0_18 = arith.constant 0 : index
      %39 = vector.load %arg5[%c0_17, %c0_18] : memref<8x128xf32, #tpu.memory_space<vmem>>, vector<8x128xf32>
      tpu.vector_store %arg5[%c0_17, %c0_18], %38 {strides = array<i32>} : memref<8x128xf32, #tpu.memory_space<vmem>>, vector<8x128xf32>,
    } else {
    }
    %true = arith.constant true
    %22 = arith.xori %19, %true : i1
    %23 = arith.extui %22 : i1 to i32
    %c0_i32_9 = arith.constant 0 : i32
    %24 = arith.cmpi ne, %23, %c0_i32_9 : i32
    scf.if %24 {
      %c0_12 = arith.constant 0 : index
      %c0_13 = arith.constant 0 : index
      %28 = vector.load %arg5[%c0_12, %c0_13] : memref<8x128xf32, #tpu.memory_space<vmem>>, vector<8x128xf32>
      %29 = vector.shape_cast %14 : vector<16x128xf32> to vector<2x8x128xf32>
      %cst_14 = arith.constant dense<0.000000e+00> : vector<8x128xf32>
      %30 = vector.multi_reduction <add>, %29, %cst_14 [0] : vector<2x8x128xf32> to vector<8x128xf32>
      %31 = arith.addf %28, %30 : vector<8x128xf32>
      %c0_15 = arith.constant 0 : index
      %c0_16 = arith.constant 0 : index
      %32 = vector.load %arg5[%c0_15, %c0_16] : memref<8x128xf32, #tpu.memory_space<vmem>>, vector<8x128xf32>
      tpu.vector_store %arg5[%c0_15, %c0_16], %31 {strides = array<i32>} : memref<8x128xf32, #tpu.memory_space<vmem>>, vector<8x128xf32>,
    } else {
    }
    %c0_i32_10 = arith.constant 0 : i32
    %25 = arith.cmpi eq, %arg1, %c0_i32_10 : i32
    %26 = arith.extui %25 : i1 to i32
    %c0_i32_11 = arith.constant 0 : i32
    %27 = arith.cmpi ne, %26, %c0_i32_11 : i32
    scf.if %27 {
      %c0_12 = arith.constant 0 : index
      %c0_13 = arith.constant 0 : index
      %28 = vector.load %arg5[%c0_12, %c0_13] : memref<8x128xf32, #tpu.memory_space<vmem>>, vector<8x128xf32>
      %c0_14 = arith.constant 0 : index
      %c0_15 = arith.constant 0 : index
      %29 = vector.load %arg4[%c0_14, %c0_15] : memref<8x128xf32, #tpu.memory_space<vmem>>, vector<8x128xf32>
      tpu.vector_store %arg4[%c0_14, %c0_15], %28 {strides = array<i32>} : memref<8x128xf32, #tpu.memory_space<vmem>>, vector<8x128xf32>,
    } else {
    }
    return
  }
  func.func @transform_0(%arg0: i32, %arg1: i32) -> (i32, i32) {
    %c1_i32 = arith.constant 1 : i32
    %0 = arith.muli %arg0, %c1_i32 : i32
    %1 = arith.addi %0, %arg1 : i32
    %c0_i32 = arith.constant 0 : i32
    %2 = arith.minsi %1, %c0_i32 : i32
    %c0_i32_0 = arith.constant 0 : i32
    %c0_i32_1 = arith.constant 0 : i32
    return %2, %c0_i32_0 : i32, i32
  }
  func.func @transform_1(%arg0: i32, %arg1: i32) -> (i32, i32) {
    %c1_i32 = arith.constant 1 : i32
    %0 = arith.muli %arg0, %c1_i32 : i32
    %1 = arith.addi %0, %arg1 : i32
    %c0_i32 = arith.constant 0 : i32
    %2 = arith.minsi %1, %c0_i32 : i32
    %c0_i32_0 = arith.constant 0 : i32
    %c0_i32_1 = arith.constant 0 : i32
    return %2, %c0_i32_0 : i32, i32
  }
  func.func @transform_2(%arg0: i32, %arg1: i32) -> (i32, i32) {
    %c0_i32 = arith.constant 0 : i32
    %c0_i32_0 = arith.constant 0 : i32
    return %arg0, %c0_i32 : i32, i32
  }
}

</mosaic_0001>

<bundles_post_ra>
// kernel: tpu_custom_call.1
= control target key start
LH: loop header
LB: loop body
LE: loop exit
PB: predicated region body
PF: predicated region fallthrough
CT: control target
= control target key end

     0   :  { %7 = vsyncpa [#allocation4], 0  ;;  %s257_s0 = inlined_call_operand.hbm [shape: f32[16,128], index: 0, kind: input, shape index: {}]   ;;  %s258_s1 = inlined_call_operand.hbm [shape: f32[16,128], index: 1, kind: input, shape index: {}]   ;;  %s259_s2 = inlined_call_operand.hbm [shape: f32[8,128], index: 2, kind: output, shape index: {}]  }
   0x1   :  { %8 = vsyncpa [#allocation7], 0 }
   0x2   :  { %9 = vsyncpa [#allocation5], 0  ;;  %s20_s11 = sshll.u32 %s257_s0, 4  ;;  %s228_s12 = smov [#allocation3]   ;;  %s21_s11 = int_to_ptr.hbm [resolvable:$true] %s20_s11 }
   0x3   :  { %s22_s13 = sshll.u32 %s228_s12, 4  ;;  %s39_s16 = sshll.u32 %s258_s1, 4  ;;  %s23_s13 = int_to_ptr.vmem [resolvable:$true] %s22_s13  ;;  %s40_s16 = int_to_ptr.hbm [resolvable:$true] %s39_s16 }
   0x4   :  { %s229_s17 = smov 128   ;;  %s230_s18 = smov 8  }
   0x5   :  { %28 = dma.hbm_to_vmem [thread:$0]  %s21_s11, 256, %s23_s13, [#allocation4], %s229_s17, %s229_s17, %s230_s18  }
   0x6   :  { %s231_s19 = smov [#allocation6]  }
   0x7   :  { %s41_s20 = sshll.u32 %s231_s19, 4  ;;  %s42_s20 = int_to_ptr.vmem [resolvable:$true] %s41_s20 }
   0x8   :  { %47 = dma.hbm_to_vmem [thread:$0]  %s40_s16, 256, %s42_s20, [#allocation7], %s229_s17, %s229_s17, %s230_s18  }
   0x9   :  { %222 = dma.done.wait [#allocation4], 256  }
   0xa   :  { %223 = vsyncadd [#allocation4], 4294967040 }
   0xb   :  { %224 = dma.done.wait [#allocation7], 256  }
   0xc   :  { %225 = vsyncadd [#allocation7], 4294967040  ;;  %v69_v0 = vld [vmem:[#allocation3] sm:$0xff]  ;;  %v70_v1 = vld [vmem:[#allocation3 + $0x8] sm:$0xff]  ;;  %s232_s0 = smov [#allocation8]   ;;  %s128_s23 = sshll.u32 %s259_s2, 4  ;;  %s129_s23 = int_to_ptr.hbm [resolvable:$true] %s128_s23 }
   0xd   :  { %v71_v2 = vld [vmem:[#allocation6] sm:$0xff]  ;;  %v72_v3 = vld [vmem:[#allocation6 + $0x8] sm:$0xff]  ;;  %s126_s1 = sshll.u32 %s232_s0, 4  ;;  %s127_s1 = int_to_ptr.vmem [resolvable:$true] %s126_s1 }
   0xe   :  { %v73_v4 = vsub.f32 %v69_v0, %v71_v2  ;;  %v74_v5 = vsub.f32 %v70_v1, %v72_v3 }
  0x10   :  { %v75_v6 = vand.u32 2147483647, %v73_v4  ;;  %v79_v7 = vmul.f32 %v73_v4, %v73_v4  ;;  %v76_v8 = vand.u32 2147483647, %v74_v5  ;;  %v80_v9 = vmul.f32 %v74_v5, %v74_v5 }
  0x12   :  { %vm77_vm0 = vcmp.lt.f32.partialorder %v75_v6, 1.0  ;;  %v81_v10 = vmul.f32 0.5, %v79_v7  ;;  %v143_v11 = vadd.f32 -0.5, %v75_v6  ;;  %vm78_vm1 = vcmp.lt.f32.partialorder %v76_v8, 1.0 }
  0x13   :  { %v82_v12 = vmul.f32 0.5, %v80_v9  ;;  %v144_v13 = vadd.f32 -0.5, %v76_v8 }
  0x14   :  { %v85_v14 = vsel %vm77_vm0, %v81_v10, %v143_v11 }
  0x15   :  { %v86_v15 = vsel %vm78_vm1, %v82_v12, %v144_v13 }
  0x16   :  { %v113_v16 = vadd.f32 %v86_v15, %v85_v14 }
  0x18   :  { %120 = vst [vmem:[#allocation8] sm:$0xff] %v113_v16 }
  0x19   :  { %131 = dma.vmem_to_hbm [thread:$0]  %s127_s1, 128, %s129_s23, [#allocation5]  }
  0x1a   :  { %226 = dma.done.wait [#allocation5], 128  }
  0x1b   :  { %227 = vsyncadd [#allocation5], 4294967168 }
  0x1c   :  { %136 = vsyncpa [#allocation4], 1 }
  0x1d   :  { %137 = vsyncpa [#allocation7], 1 }
  0x1e   :  { %138 = vsyncpa [#allocation5], 1 }

</bundles_post_ra>
